<compile_context>
chip_gen: v7x
topology: tpu7x:2x2x1
jax: 0.10.0
libtpu: 0.0.40
codegen_flags: <defaults>
</compile_context>

<pallas_src>
import functools
import math

import jax
import jax.numpy as jnp
from jax.experimental import pallas as pl
from jax.experimental.pallas import tpu as pltpu

_LANE = 128
_BLOCK_BYTES = 8 * 1024 * 1024      # budget for one (double-buffered) input block
_VMEM_LIMIT = 32 * 1024 * 1024      # safe on v5e/v6e (128 MiB) and v7x (64 MiB)


def _sublane(dtype) -> int:
    """Sublane granularity: 8 rows for f32, 16 for bf16, 32 for int8/fp8."""
    return max(8, 32 // jnp.dtype(dtype).itemsize)


def _largest_aligned_divisor(n: int, align: int, limit: int):
    """Largest multiple of `align` that divides `n` and is <= limit (or None)."""
    t = (min(limit, n) // align) * align
    while t >= align:
        if n % t == 0:
            return t
        t -= align
    return None


def _mean_single_kernel(x_ref, o_ref, *, inv_r, axis):
    """Whole reduction extent in one block: reduce + scale straight into o_ref."""
    s = jnp.sum(x_ref[...].astype(jnp.float32), axis=axis)
    o_ref[...] = (s * inv_r).astype(o_ref.dtype)


def _mean_multi_kernel(x_ref, o_ref, acc_ref, *, inv_r, axis, grid_axis):
    """Reduction split over grid axis `grid_axis`: accumulate in f32 scratch."""
    k = pl.program_id(grid_axis)

    @pl.when(k == 0)
    def _():
        acc_ref[...] = jnp.zeros_like(acc_ref)

    acc_ref[...] += jnp.sum(x_ref[...].astype(jnp.float32), axis=axis)

    @pl.when(k == pl.num_programs(grid_axis) - 1)
    def _():
        o_ref[...] = (acc_ref[...] * inv_r).astype(o_ref.dtype)


def pallas_mean(x: jax.Array, dim: int) -> jax.Array:
    """Equivalent of torch.Tensor.mean(dim=dim) for floating-point x."""
    ndim = x.ndim
    if dim < 0:
        dim += ndim
    shape = x.shape
    lead = math.prod(shape[:dim])
    r = shape[dim]
    trail = math.prod(shape[dim + 1:])
    out_shape_final = shape[:dim] + shape[dim + 1:]

    itemsize = jnp.dtype(x.dtype).itemsize
    sub = _sublane(x.dtype)
    inv_r = 1.0 / r
    cost = pl.CostEstimate(
        flops=lead * r * trail,
        transcendentals=0,
        bytes_accessed=(lead * r * trail + lead * trail) * itemsize,
    )

    # ---------- Last-dim reduction (TRAIL == 1): lane-dense (1, LEAD) output --
    if trail == 1:
        x3 = x.reshape(1, lead, r)

        if lead * r * itemsize <= _BLOCK_BYTES:
            tile_lead, tile_r = lead, r                    # single block
        elif min(lead, _LANE) * r * itemsize <= _BLOCK_BYTES:
            # Full R per block; tile LEAD (lead >= 128 here).
            tile_lead = (_BLOCK_BYTES // (r * itemsize)) // _LANE * _LANE
            tile_r = r
        else:
            # R itself is too large: split R over a reduction grid axis with a
            # lane-aligned tile that divides R exactly (no padded lanes in sum).
            tile_lead = lead if lead < _LANE else _LANE
            max_r = max(1, _BLOCK_BYTES // (tile_lead * itemsize))
            tile_r = _largest_aligned_divisor(r, _LANE, max_r)

        if tile_r is not None:
            n_lead = pl.cdiv(lead, tile_lead)
            n_r = r // tile_r
            if n_r == 1:
                kernel = functools.partial(_mean_single_kernel, inv_r=inv_r, axis=2)
                grid = (n_lead,)
                in_specs = [pl.BlockSpec((1, tile_lead, r), lambda i: (0, i, 0))]
                out_specs = pl.BlockSpec((1, tile_lead), lambda i: (0, i))
                scratch = []
                dims = ("parallel",)
            else:
                kernel = functools.partial(
                    _mean_multi_kernel, inv_r=inv_r, axis=2, grid_axis=1)
                grid = (n_lead, n_r)                        # reduction axis last
                in_specs = [pl.BlockSpec((1, tile_lead, tile_r),
                                         lambda i, k: (0, i, k))]
                out_specs = pl.BlockSpec((1, tile_lead), lambda i, k: (0, i))
                scratch = [pltpu.VMEM((1, tile_lead), jnp.float32)]
                dims = ("parallel", "arbitrary")

            out = pl.pallas_call(
                kernel,
                out_shape=jax.ShapeDtypeStruct((1, lead), x.dtype),
                grid_spec=pltpu.PrefetchScalarGridSpec(
                    num_scalar_prefetch=0,
                    grid=grid,
                    in_specs=in_specs,
                    out_specs=out_specs,
                    scratch_shapes=scratch,
                ),
                compiler_params=pltpu.CompilerParams(
                    dimension_semantics=dims,
                    vmem_limit_bytes=_VMEM_LIMIT,
                ),
                cost_estimate=cost,
            )(x3)
            return out.reshape(out_shape_final)
        # TODO(synk): no 128-aligned divisor of R fits the block budget (huge
        # prime R); fall through to the general (LEAD, R, 1) layout below.

    # ---------- General case: (LEAD, R, TRAIL), reduce axis 1 -----------------
    x3 = x.reshape(lead, r, trail)

    # Reserve room so the output/lead tile can be sublane-aligned (or full lead).
    lead_reserve = min(lead, sub)
    plane_budget = max(1, _BLOCK_BYTES // lead_reserve)

    # TRAIL tile: full trail if at least `sub` reduction rows still fit, else
    # the largest multiple of 128 lanes that does (trail padding is masked out).
    if trail * sub * itemsize <= plane_budget:
        tile_trail = trail
    else:
        tile_trail = max(_LANE, (plane_budget // (sub * itemsize)) // _LANE * _LANE)
    n_trail = pl.cdiv(trail, tile_trail)

    # R tile: whole R if it fits (single step, no scratch), else the largest
    # sublane-aligned divisor of R that fits (must divide R exactly so no
    # padded garbage enters the sum).
    max_r_rows = max(1, plane_budget // (tile_trail * itemsize))
    if r <= max_r_rows:
        tile_r = r
    else:
        tile_r = _largest_aligned_divisor(r, sub, max_r_rows)
        if tile_r is None:
            # TODO(synk): no sublane-aligned divisor of R fits the budget
            # (e.g. huge prime R); fall back to one full-R block rather than
            # ragged tiles that would corrupt the reduction.
            tile_r = r
    n_r = r // tile_r

    # LEAD tile: whatever budget remains, sublane-aligned (or the full LEAD).
    rows = max(1, _BLOCK_BYTES // (tile_r * tile_trail * itemsize))
    if rows >= lead:
        tile_lead = lead
    else:
        tile_lead = max(sub, (rows // sub) * sub)
    n_lead = pl.cdiv(lead, tile_lead)

    if n_r == 1:
        kernel = functools.partial(_mean_single_kernel, inv_r=inv_r, axis=1)
        grid = (n_lead, n_trail)
        in_specs = [pl.BlockSpec((tile_lead, r, tile_trail),
                                 lambda i, j: (i, 0, j))]
        out_specs = pl.BlockSpec((tile_lead, tile_trail), lambda i, j: (i, j))
        scratch_shapes = []
        dims = ("parallel", "parallel")
    else:
        kernel = functools.partial(_mean_multi_kernel, inv_r=inv_r, axis=1,
                                   grid_axis=2)
        grid = (n_lead, n_trail, n_r)          # reduction axis last
        in_specs = [pl.BlockSpec((tile_lead, tile_r, tile_trail),
                                 lambda i, j, k: (i, k, j))]
        out_specs = pl.BlockSpec((tile_lead, tile_trail),
                                 lambda i, j, k: (i, j))
        scratch_shapes = [pltpu.VMEM((tile_lead, tile_trail), jnp.float32)]
        dims = ("parallel", "parallel", "arbitrary")

    out = pl.pallas_call(
        kernel,
        out_shape=jax.ShapeDtypeStruct((lead, trail), x.dtype),
        grid_spec=pltpu.PrefetchScalarGridSpec(
            num_scalar_prefetch=0,
            grid=grid,
            in_specs=in_specs,
            out_specs=out_specs,
            scratch_shapes=scratch_shapes,
        ),
        compiler_params=pltpu.CompilerParams(
            dimension_semantics=dims,
            vmem_limit_bytes=_VMEM_LIMIT,
        ),
        cost_estimate=cost,
    )(x3)
    return out.reshape(out_shape_final)


if __name__ == "__main__":
    key = jax.random.PRNGKey(0)

    # Mean(dim=1) over a (batch=2, seq=16, hidden=32) activation tensor.
    x = jax.random.normal(key, (2, 16, 32), dtype=jnp.float32)
    y = jax.block_until_ready(pallas_mean(x, 1))
    y_ref = jnp.mean(x, axis=1)
    assert y.shape == y_ref.shape, (y.shape, y_ref.shape)
    assert jnp.allclose(y, y_ref, atol=1e-5, rtol=1e-5)

    # Mean(dim=-1): exercises the lane-dense last-dim-reduction path.
    y2 = jax.block_until_ready(pallas_mean(x, -1))
    y2_ref = jnp.mean(x, axis=-1)
    assert y2.shape == y2_ref.shape, (y2.shape, y2_ref.shape)
    assert jnp.allclose(y2, y2_ref, atol=1e-5, rtol=1e-5)

    # Mean(dim=0): LEAD == 1 edge case.
    y3 = jax.block_until_ready(pallas_mean(x, 0))
    y3_ref = jnp.mean(x, axis=0)
    assert y3.shape == y3_ref.shape, (y3.shape, y3_ref.shape)
    assert jnp.allclose(y3, y3_ref, atol=1e-5, rtol=1e-5)

    # Mean(dim=1) over a 4-D (batch=2, channels=4, 16, 16) tensor.
    x2 = jax.random.normal(jax.random.PRNGKey(1), (2, 4, 16, 16), dtype=jnp.float32)
    y4 = jax.block_until_ready(pallas_mean(x2, 1))
    y4_ref = jnp.mean(x2, axis=1)
    assert y4.shape == y4_ref.shape, (y4.shape, y4_ref.shape)
    assert jnp.allclose(y4, y4_ref, atol=1e-5, rtol=1e-5)

    print("KERNEL_OK")
</pallas_src>

<mosaic_0001>
module attributes {stable_mosaic.version = 11 : i64} {
  func.func @_mean_single_kernel(%arg0: i32, %arg1: i32, %arg2: memref<2x16x32xf32, #tpu.memory_space<vmem>>, %arg3: memref<2x32xf32, #tpu.memory_space<vmem>>) attributes {dimension_semantics = [#tpu.dimension_semantics<parallel>, #tpu.dimension_semantics<parallel>], iteration_bounds = array<i64: 1, 1>, scalar_prefetch = 0 : i64, scratch_operands = 0 : i64, tpu.core_type = #tpu.core_type<tc>, window_params = [{transform_indices = @transform_0, window_bounds = array<i64: 2, 16, 32>}, {transform_indices = @transform_1, window_bounds = array<i64: 2, 32>}]} {
    %c0 = arith.constant 0 : index
    %c0_0 = arith.constant 0 : index
    %c0_1 = arith.constant 0 : index
    %0 = vector.load %arg2[%c0, %c0_0, %c0_1] : memref<2x16x32xf32, #tpu.memory_space<vmem>>, vector<2x16x32xf32>
    %cst = arith.constant dense<0.000000e+00> : vector<2x32xf32>
    %1 = vector.multi_reduction <add>, %0, %cst [1] : vector<2x16x32xf32> to vector<2x32xf32>
    %cst_2 = arith.constant 6.250000e-02 : f32
    %2 = vector.broadcast %cst_2 : f32 to vector<2x32xf32>
    %3 = arith.mulf %1, %2 : vector<2x32xf32>
    %c0_3 = arith.constant 0 : index
    %c0_4 = arith.constant 0 : index
    %4 = vector.load %arg3[%c0_3, %c0_4] : memref<2x32xf32, #tpu.memory_space<vmem>>, vector<2x32xf32>
    tpu.vector_store %arg3[%c0_3, %c0_4], %3 {strides = array<i32>} : memref<2x32xf32, #tpu.memory_space<vmem>>, vector<2x32xf32>,
    return
  }
  func.func @transform_0(%arg0: i32, %arg1: i32) -> (i32, i32, i32) {
    %c0_i32 = arith.constant 0 : i32
    %c0_i32_0 = arith.constant 0 : i32
    return %arg0, %c0_i32, %arg1 : i32, i32, i32
  }
  func.func @transform_1(%arg0: i32, %arg1: i32) -> (i32, i32) {
    %c0_i32 = arith.constant 0 : i32
    return %arg0, %arg1 : i32, i32
  }
}

</mosaic_0001>

<bundles_post_ra>
// kernel: tpu_custom_call.1
= control target key start
LH: loop header
LB: loop body
LE: loop exit
PB: predicated region body
PF: predicated region fallthrough
CT: control target
= control target key end

     0   :  { %6 = vsyncpa [#allocation3], 0  ;;  %s160_s0 = inlined_call_operand.hbm [shape: f32[2,16,32], index: 0, kind: input, shape index: {}]   ;;  %s161_s1 = inlined_call_operand.hbm [shape: f32[2,32], index: 1, kind: output, shape index: {}]  }
   0x1   :  { %7 = vsyncpa [#allocation4], 0  ;;  %s122_s6 = smov [#allocation2]   ;;  %s74_s10 = scalar_lea.hbm %s160_s0, 512 }
   0x2   :  { %s13_s7 = sshll.u32 %s122_s6, 4  ;;  %p75_p0 = scmp.ne.s32.totalorder %s160_s0, %s74_s10  ;;  %s14_s7 = int_to_ptr.vmem [resolvable:$true] %s13_s7 }
   0x3   :  { %p78_p1 = scmp.lt.u32.totalorder %s74_s10, %s160_s0 }
   0x5   :  { %p80_p2 = pnand %p78_p1, %p75_p0 }
   0x7   :  { %83 = shalt.err (!%p80_p2)
}
   0x8   :  { %s84_s15 = scalar_lea.vmem %s14_s7, 512  ;;  %p89_p4 = scmp.lt.s32.totalorder %s14_s7, %s14_s7 }
   0x9   :  { %p85_p3 = scmp.ne.s32.totalorder %s14_s7, %s84_s15  ;;  %p90_p5 = scmp.lt.s32.totalorder %s84_s15, %s84_s15 }
   0xb   :  { %p91_p6 = por %p90_p5, %p89_p4 }
   0xd   :  { %p92_p7 = pnand %p91_p6, %p85_p3 }
   0xf   :  { %95 = shalt.err (!%p92_p7)
}
  0x10   :  { %s123_s16 = smov 128   ;;  %s124_s17 = smov 8  }
  0x11   :  { %19 = dma.hbm_to_vmem [thread:$0]  %s160_s0, 512, %s14_s7, [#allocation3], %s123_s16, %s123_s16, %s124_s17  }
  0x12   :  { %118 = dma.done.wait [#allocation3], 512  }
  0x13   :  { %119 = vsyncadd [#allocation3], 4294966784  ;;  %vm27_vm0 = vcmask 261120   ;;  %v23_v0 = vld [vmem:[#allocation2] sm:$0xff]  ;;  %v24_v1 = vld [vmem:[#allocation2 + $0x8] sm:$0xff]  ;;  %s125_s0 = smov [#allocation5]  }
  0x14   :  { %v25_v2 = vld [vmem:[#allocation2 + $0x10] sm:$0xff]  ;;  %v26_v3 = vld [vmem:[#allocation2 + $0x18] sm:$0xff]  ;;  %v28_v4 = vsel %vm27_vm0, %v23_v0, 0.0  ;;  %v29_v5 = vsel %vm27_vm0, %v24_v1, 0.0  ;;  %s61_s20 = sshll.u32 %s125_s0, 4  ;;  %vm50_vm1 = vcmask 1041409   ;;  %s62_s20 = int_to_ptr.vmem [resolvable:$true] %s61_s20 }
  0x15   :  { %v37_v6 = vsel %vm27_vm0, %v25_v2, 0.0  ;;  %v30_v7 = vadd.f32 %v29_v5, %v28_v4  ;;  %v38_v8 = vsel %vm27_vm0, %v26_v3, 0.0  ;;  %vm53_vm2 = vcmask 254976   ;;  %s96_s21 = scalar_lea.vmem %s62_s20, 32  ;;  %p101_p9 = scmp.lt.s32.totalorder %s62_s20, %s62_s20 }
  0x16   :  { %v39_v9 = vadd.f32 %v38_v8, %v37_v6  ;;  %p97_p8 = scmp.ne.s32.totalorder %s62_s20, %s96_s21  ;;  %p102_p10 = scmp.lt.s32.totalorder %s96_s21, %s96_s21 }
  0x17   :  { %v31_v10 = vrot.slane %v30_v7, 4 }
  0x18   :  { %v40_v11 = vrot.slane %v39_v9, 4  ;;  %p103_p11 = por %p102_p10, %p101_p9 }
  0x19   :  { %v32_v12 = vadd.f32 %v31_v10, %v30_v7 }
  0x1a   :  { %v41_v13 = vadd.f32 %v40_v11, %v39_v9  ;;  %p104_p12 = pnand %p103_p11, %p97_p8 }
  0x1b   :  { %v33_v14 = vrot.slane %v32_v12, 2 }
  0x1c   :  { %v42_v15 = vrot.slane %v41_v13, 2 }
  0x1d   :  { %v34_v16 = vadd.f32 %v33_v14, %v32_v12 }
  0x1e   :  { %v43_v17 = vadd.f32 %v42_v15, %v41_v13 }
  0x1f   :  { %v35_v18 = vrot.slane %v34_v16, 1 }
  0x20   :  { %v44_v19 = vrot.slane %v43_v17, 1 }
  0x21   :  { %v36_v20 = vadd.f32 %v35_v18, %v34_v16 }
  0x22   :  { %v45_v21 = vadd.f32 %v44_v19, %v43_v17 }
  0x23   :  { %v46_v22 = vmul.f32 0.0625, %v36_v20 }
  0x24   :  { %v47_v23 = vmul.f32 0.0625, %v45_v21 }
  0x26   :  { %v51_v24 = vsel %vm50_vm1, %v47_v23, %v46_v22 }
  0x27   :  { %54 = vst.msk [vmem:[#allocation5] sm:$0x3] %vm53_vm2, %v51_v24 }
  0x28   :  { %107 = shalt.err (!%p104_p12)
}
  0x29   :  { %s108_s24 = scalar_lea.hbm %s161_s1, 32 }
  0x2a   :  { %p109_p13 = scmp.ne.s32.totalorder %s161_s1, %s108_s24  ;;  %p112_p0 = scmp.lt.u32.totalorder %s108_s24, %s161_s1 }
  0x2c   :  { %p114_p1 = pnand %p112_p0, %p109_p13 }
  0x2e   :  { %117 = shalt.err (!%p114_p1)
}
  0x2f   :  { %64 = dma.vmem_to_hbm [thread:$0]  %s62_s20, 32, %s161_s1, [#allocation4]  }
  0x30   :  { %120 = dma.done.wait [#allocation4], 32  }
  0x31   :  { %121 = vsyncadd [#allocation4], 4294967264 }
  0x32   :  { %68 = vsyncpa [#allocation3], 1 }
  0x33   :  { %69 = vsyncpa [#allocation4], 1 }

</bundles_post_ra>
